<compile_context>
chip_gen: v7x
topology: tpu7x:2x2x1
jax: 0.10.0
libtpu: 0.0.40
codegen_flags: <defaults>
</compile_context>

<pallas_src>
import functools
import math

import jax
import jax.numpy as jnp
from jax.experimental import pallas as pl
from jax.experimental.pallas import tpu as pltpu

_LANES = 128


def _exact_pow2(k, max_exp):
    """Exact float32 2.0**k for integer array k in [0, max_exp).

    Built only from selects and multiplies by exact power-of-two constants, so
    the result is bit-exact (matches torch's 2.0 ** arange buffer).
    """
    f = jnp.ones(k.shape, jnp.float32)
    b = 1
    while b < max_exp:
        f = f * jnp.where((k & b) != 0, jnp.float32(float(2 ** b)), jnp.float32(1.0))
        b *= 2
    return f


def _riffle(a, chunk):
    """Perfect-shuffle of `chunk`-wide lane groups of a (rows, w) array.

    The first w/2 lanes of `a` hold the chunks destined for even output chunk
    slots, the last w/2 lanes the odd slots.  Implemented as log2(w/(2*chunk))
    levels of "swap the 2nd and 3rd quarters of every aligned block"; each level
    uses the two opposite lane rotations (q and w-q) so the code is independent
    of the rotation sign convention.
    """
    w = a.shape[-1]
    lane = jax.lax.broadcasted_iota(jnp.int32, a.shape, 1)
    q = w // 4
    while q >= chunk:
        # lanes whose (lane mod 4q) lies in [q, 3q) == 2nd or 3rd quarter of a block
        move = ((lane - q) & (4 * q - 1)) < (2 * q)
        masked = jnp.where(move, a, 0.0)
        swapped = (pltpu.roll(masked, q, axis=1)
                   + pltpu.roll(masked, w - q, axis=1))
        a = jnp.where(move, swapped, a)
        q //= 2
    return a


def _pos_enc_packed_kernel(x_ref, o_ref, *, dim):
    """Lane-dense path.  x_ref: (tm, 128) = 128/dim points per row (freq-minor).
    o_ref: (tm, 256) whose flat layout is torch's [sin(dim)|cos(dim)] per point."""
    x = x_ref[...].astype(jnp.float32)
    lane = jax.lax.broadcasted_iota(jnp.int32, x.shape, 1)
    freqs = _exact_pow2(lane & (dim - 1), dim)      # dim divides 128 => power of two
    scaled = x * freqs
    s = jnp.sin(scaled)
    c = jnp.cos(scaled)

    if dim == _LANES:                                # one point per row: [sin | cos]
        o_ref[...] = jnp.concatenate([s, c], axis=-1)
        return

    half = _LANES // 2
    in_lo = lane < half
    # Split into the two 128-lane halves of the 256-lane output row, then
    # perfect-shuffle each half so every point's sin/cos block becomes contiguous.
    c_rot = pltpu.roll(c, half, axis=1)              # half-width rotation: symmetric
    s_rot = pltpu.roll(s, half, axis=1)
    lo = _riffle(jnp.where(in_lo, s, c_rot), dim)    # points 0 .. 128/(2*dim)-1
    hi = _riffle(jnp.where(in_lo, s_rot, c), dim)    # remaining points of the row
    o_ref[...] = jnp.concatenate([lo, hi], axis=-1)


def _pos_enc_rowwise_kernel(x_ref, o_ref):
    """Generic fallback.  x_ref: (tr, dim), o_ref: (tr, 2*dim)."""
    x = x_ref[...].astype(jnp.float32)
    dim = x.shape[-1]
    k = jax.lax.broadcasted_iota(jnp.int32, x.shape, 1)
    scaled = x * _exact_pow2(k, dim)
    o_ref[:, :dim] = jnp.sin(scaled)
    o_ref[:, dim:] = jnp.cos(scaled)


def positional_encoding(x, num_freqs: int, *, block_rows: int = 1024):
    """Pallas TPU forward of the torch PositionalEncoding module.

    x: (..., dim) with dim == num_freqs (the only shape for which the reference
    torch broadcast is generally valid).  Returns (..., 2*dim) float32.
    """
    dim = x.shape[-1]
    if dim != num_freqs:
        raise ValueError("reference torch module broadcasts only for dim == num_freqs")
    lead = x.shape[:-1]
    M = math.prod(lead) if lead else 1
    out_dtype = jnp.float32

    if M == 0 or dim == 0:
        return jnp.zeros((*lead, 2 * dim), out_dtype)

    total = M * dim
    if total % _LANES == 0 and _LANES % dim == 0:
        # Lane-dense packed path: (M, dim) viewed (free reshape) as (mg, 128).
        mg = total // _LANES
        xp = x.reshape(mg, _LANES)
        block_rows = max(8, (block_rows // 8) * 8)
        tm = min(block_rows, mg)
        out = pl.pallas_call(
            functools.partial(_pos_enc_packed_kernel, dim=dim),
            out_shape=jax.ShapeDtypeStruct((mg, 2 * _LANES), out_dtype),
            grid_spec=pltpu.PrefetchScalarGridSpec(
                num_scalar_prefetch=0,
                grid=(pl.cdiv(mg, tm),),
                in_specs=[pl.BlockSpec((tm, _LANES), lambda i: (i, 0))],
                out_specs=pl.BlockSpec((tm, 2 * _LANES), lambda i: (i, 0)),
            ),
            compiler_params=pltpu.CompilerParams(
                dimension_semantics=("parallel",)),
        )(xp)
        return out.reshape(*lead, 2 * dim)

    # Generic fallback (shape not packable into full 128-lane rows); still no
    # wrapper pad/slice/cast copies — partial tail blocks are masked by Pallas.
    x2d = x.reshape(M, dim)
    tr = min(4096, M)
    out = pl.pallas_call(
        _pos_enc_rowwise_kernel,
        out_shape=jax.ShapeDtypeStruct((M, 2 * dim), out_dtype),
        grid_spec=pltpu.PrefetchScalarGridSpec(
            num_scalar_prefetch=0,
            grid=(pl.cdiv(M, tr),),
            in_specs=[pl.BlockSpec((tr, dim), lambda i: (i, 0))],
            out_specs=pl.BlockSpec((tr, 2 * dim), lambda i: (i, 0)),
        ),
        compiler_params=pltpu.CompilerParams(
            dimension_semantics=("parallel",)),
    )(x2d)
    return out.reshape(*lead, 2 * dim)


def _reference(x, num_freqs):
    # Pure-JAX mirror of the torch forward (same broadcasting / layout).
    freqs = 2.0 ** jnp.arange(num_freqs, dtype=jnp.float32)
    xs = x[..., None, :].astype(jnp.float32) * freqs.reshape(1, 1, -1)
    out = jnp.concatenate([jnp.sin(xs), jnp.cos(xs)], axis=-1)
    return out.reshape(*out.shape[:-2], -1)


if __name__ == "__main__":
    key = jax.random.PRNGKey(0)
    batch, n_pts, dim = 2, 64, 8          # dim == num_freqs
    num_freqs = dim
    x = jax.random.normal(key, (batch, n_pts, dim), dtype=jnp.float32)

    y = jax.block_until_ready(positional_encoding(x, num_freqs))
    y_ref = _reference(x, num_freqs)
    assert y.shape == (batch, n_pts, 2 * dim), y.shape
    assert jnp.allclose(y, y_ref, atol=1e-5, rtol=1e-5), float(jnp.max(jnp.abs(y - y_ref)))

    # Also exercise the generic fallback path (point count not packable to 128 lanes).
    x2 = jax.random.normal(jax.random.PRNGKey(1), (3, 7, 8), dtype=jnp.float32)
    y2 = jax.block_until_ready(positional_encoding(x2, 8))
    assert jnp.allclose(y2, _reference(x2, 8), atol=1e-5, rtol=1e-5)

    print("KERNEL_OK")
</pallas_src>

<mosaic_0001>
module attributes {stable_mosaic.version = 11 : i64} {
  func.func @_pos_enc_packed_kernel(%arg0: i32, %arg1: memref<8x128xf32, #tpu.memory_space<vmem>>, %arg2: memref<8x256xf32, #tpu.memory_space<vmem>>) attributes {dimension_semantics = [#tpu.dimension_semantics<parallel>], iteration_bounds = array<i64: 1>, scalar_prefetch = 0 : i64, scratch_operands = 0 : i64, tpu.core_type = #tpu.core_type<tc>, window_params = [{transform_indices = @transform_0, window_bounds = array<i64: 8, 128>}, {transform_indices = @transform_1, window_bounds = array<i64: 8, 256>}]} {
    %c0 = arith.constant 0 : index
    %c0_0 = arith.constant 0 : index
    %0 = vector.load %arg1[%c0, %c0_0] : memref<8x128xf32, #tpu.memory_space<vmem>>, vector<8x128xf32>
    %1 = tpu.iota {dimensions = array<i32: 1>} : vector<8x128xi32>
    %c7_i32 = arith.constant 7 : i32
    %2 = vector.broadcast %c7_i32 : i32 to vector<8x128xi32>
    %3 = arith.andi %1, %2 : vector<8x128xi32>
    %cst = arith.constant 1.000000e+00 : f32
    %4 = vector.broadcast %cst : f32 to vector<8x128xf32>
    %c1_i32 = arith.constant 1 : i32
    %5 = vector.broadcast %c1_i32 : i32 to vector<8x128xi32>
    %6 = arith.andi %3, %5 : vector<8x128xi32>
    %c0_i32 = arith.constant 0 : i32
    %7 = vector.broadcast %c0_i32 : i32 to vector<8x128xi32>
    %8 = arith.cmpi ne, %6, %7 : vector<8x128xi32>
    %cst_1 = arith.constant 2.000000e+00 : f32
    %cst_2 = arith.constant 1.000000e+00 : f32
    %9 = vector.broadcast %cst_1 : f32 to vector<8x128xf32>
    %10 = vector.broadcast %cst_2 : f32 to vector<8x128xf32>
    %11 = arith.select %8, %9, %10 : vector<8x128xi1>, vector<8x128xf32>
    %12 = arith.mulf %4, %11 : vector<8x128xf32>
    %c2_i32 = arith.constant 2 : i32
    %13 = vector.broadcast %c2_i32 : i32 to vector<8x128xi32>
    %14 = arith.andi %3, %13 : vector<8x128xi32>
    %c0_i32_3 = arith.constant 0 : i32
    %15 = vector.broadcast %c0_i32_3 : i32 to vector<8x128xi32>
    %16 = arith.cmpi ne, %14, %15 : vector<8x128xi32>
    %cst_4 = arith.constant 4.000000e+00 : f32
    %cst_5 = arith.constant 1.000000e+00 : f32
    %17 = vector.broadcast %cst_4 : f32 to vector<8x128xf32>
    %18 = vector.broadcast %cst_5 : f32 to vector<8x128xf32>
    %19 = arith.select %16, %17, %18 : vector<8x128xi1>, vector<8x128xf32>
    %20 = arith.mulf %12, %19 : vector<8x128xf32>
    %c4_i32 = arith.constant 4 : i32
    %21 = vector.broadcast %c4_i32 : i32 to vector<8x128xi32>
    %22 = arith.andi %3, %21 : vector<8x128xi32>
    %c0_i32_6 = arith.constant 0 : i32
    %23 = vector.broadcast %c0_i32_6 : i32 to vector<8x128xi32>
    %24 = arith.cmpi ne, %22, %23 : vector<8x128xi32>
    %cst_7 = arith.constant 1.600000e+01 : f32
    %cst_8 = arith.constant 1.000000e+00 : f32
    %25 = vector.broadcast %cst_7 : f32 to vector<8x128xf32>
    %26 = vector.broadcast %cst_8 : f32 to vector<8x128xf32>
    %27 = arith.select %24, %25, %26 : vector<8x128xi1>, vector<8x128xf32>
    %28 = arith.mulf %20, %27 : vector<8x128xf32>
    %29 = arith.mulf %0, %28 : vector<8x128xf32>
    %30 = math.sin %29 : vector<8x128xf32>
    %31 = math.cos %29 : vector<8x128xf32>
    %c64_i32 = arith.constant 64 : i32
    %32 = vector.broadcast %c64_i32 : i32 to vector<8x128xi32>
    %33 = arith.cmpi slt, %1, %32 : vector<8x128xi32>
    %c64_i32_9 = arith.constant 64 : i32
    %34 = tpu.dynamic_rotate %31 by %c64_i32_9 dim 1 : vector<8x128xf32>, i32 -> vector<8x128xf32>
    %c64_i32_10 = arith.constant 64 : i32
    %35 = tpu.dynamic_rotate %30 by %c64_i32_10 dim 1 : vector<8x128xf32>, i32 -> vector<8x128xf32>
    %36 = arith.select %33, %30, %34 : vector<8x128xi1>, vector<8x128xf32>
    %37 = tpu.iota {dimensions = array<i32: 1>} : vector<8x128xi32>
    %c32_i32 = arith.constant 32 : i32
    %38 = vector.broadcast %c32_i32 : i32 to vector<8x128xi32>
    %39 = arith.subi %37, %38 : vector<8x128xi32>
    %c127_i32 = arith.constant 127 : i32
    %40 = vector.broadcast %c127_i32 : i32 to vector<8x128xi32>
    %41 = arith.andi %39, %40 : vector<8x128xi32>
    %c64_i32_11 = arith.constant 64 : i32
    %42 = vector.broadcast %c64_i32_11 : i32 to vector<8x128xi32>
    %43 = arith.cmpi slt, %41, %42 : vector<8x128xi32>
    %cst_12 = arith.constant 0.000000e+00 : f32
    %44 = vector.broadcast %cst_12 : f32 to vector<8x128xf32>
    %45 = arith.select %43, %36, %44 : vector<8x128xi1>, vector<8x128xf32>
    %c32_i32_13 = arith.constant 32 : i32
    %46 = tpu.dynamic_rotate %45 by %c32_i32_13 dim 1 : vector<8x128xf32>, i32 -> vector<8x128xf32>
    %c96_i32 = arith.constant 96 : i32
    %47 = tpu.dynamic_rotate %45 by %c96_i32 dim 1 : vector<8x128xf32>, i32 -> vector<8x128xf32>
    %48 = arith.addf %46, %47 : vector<8x128xf32>
    %49 = arith.select %43, %48, %36 : vector<8x128xi1>, vector<8x128xf32>
    %c16_i32 = arith.constant 16 : i32
    %50 = vector.broadcast %c16_i32 : i32 to vector<8x128xi32>
    %51 = arith.subi %37, %50 : vector<8x128xi32>
    %c63_i32 = arith.constant 63 : i32
    %52 = vector.broadcast %c63_i32 : i32 to vector<8x128xi32>
    %53 = arith.andi %51, %52 : vector<8x128xi32>
    %c32_i32_14 = arith.constant 32 : i32
    %54 = vector.broadcast %c32_i32_14 : i32 to vector<8x128xi32>
    %55 = arith.cmpi slt, %53, %54 : vector<8x128xi32>
    %cst_15 = arith.constant 0.000000e+00 : f32
    %56 = vector.broadcast %cst_15 : f32 to vector<8x128xf32>
    %57 = arith.select %55, %49, %56 : vector<8x128xi1>, vector<8x128xf32>
    %c16_i32_16 = arith.constant 16 : i32
    %58 = tpu.dynamic_rotate %57 by %c16_i32_16 dim 1 : vector<8x128xf32>, i32 -> vector<8x128xf32>
    %c112_i32 = arith.constant 112 : i32
    %59 = tpu.dynamic_rotate %57 by %c112_i32 dim 1 : vector<8x128xf32>, i32 -> vector<8x128xf32>
    %60 = arith.addf %58, %59 : vector<8x128xf32>
    %61 = arith.select %55, %60, %49 : vector<8x128xi1>, vector<8x128xf32>
    %c8_i32 = arith.constant 8 : i32
    %62 = vector.broadcast %c8_i32 : i32 to vector<8x128xi32>
    %63 = arith.subi %37, %62 : vector<8x128xi32>
    %c31_i32 = arith.constant 31 : i32
    %64 = vector.broadcast %c31_i32 : i32 to vector<8x128xi32>
    %65 = arith.andi %63, %64 : vector<8x128xi32>
    %c16_i32_17 = arith.constant 16 : i32
    %66 = vector.broadcast %c16_i32_17 : i32 to vector<8x128xi32>
    %67 = arith.cmpi slt, %65, %66 : vector<8x128xi32>
    %cst_18 = arith.constant 0.000000e+00 : f32
    %68 = vector.broadcast %cst_18 : f32 to vector<8x128xf32>
    %69 = arith.select %67, %61, %68 : vector<8x128xi1>, vector<8x128xf32>
    %c8_i32_19 = arith.constant 8 : i32
    %70 = tpu.dynamic_rotate %69 by %c8_i32_19 dim 1 : vector<8x128xf32>, i32 -> vector<8x128xf32>
    %c120_i32 = arith.constant 120 : i32
    %71 = tpu.dynamic_rotate %69 by %c120_i32 dim 1 : vector<8x128xf32>, i32 -> vector<8x128xf32>
    %72 = arith.addf %70, %71 : vector<8x128xf32>
    %73 = arith.select %67, %72, %61 : vector<8x128xi1>, vector<8x128xf32>
    %74 = arith.select %33, %35, %31 : vector<8x128xi1>, vector<8x128xf32>
    %75 = tpu.iota {dimensions = array<i32: 1>} : vector<8x128xi32>
    %c32_i32_20 = arith.constant 32 : i32
    %76 = vector.broadcast %c32_i32_20 : i32 to vector<8x128xi32>
    %77 = arith.subi %75, %76 : vector<8x128xi32>
    %c127_i32_21 = arith.constant 127 : i32
    %78 = vector.broadcast %c127_i32_21 : i32 to vector<8x128xi32>
    %79 = arith.andi %77, %78 : vector<8x128xi32>
    %c64_i32_22 = arith.constant 64 : i32
    %80 = vector.broadcast %c64_i32_22 : i32 to vector<8x128xi32>
    %81 = arith.cmpi slt, %79, %80 : vector<8x128xi32>
    %cst_23 = arith.constant 0.000000e+00 : f32
    %82 = vector.broadcast %cst_23 : f32 to vector<8x128xf32>
    %83 = arith.select %81, %74, %82 : vector<8x128xi1>, vector<8x128xf32>
    %c32_i32_24 = arith.constant 32 : i32
    %84 = tpu.dynamic_rotate %83 by %c32_i32_24 dim 1 : vector<8x128xf32>, i32 -> vector<8x128xf32>
    %c96_i32_25 = arith.constant 96 : i32
    %85 = tpu.dynamic_rotate %83 by %c96_i32_25 dim 1 : vector<8x128xf32>, i32 -> vector<8x128xf32>
    %86 = arith.addf %84, %85 : vector<8x128xf32>
    %87 = arith.select %81, %86, %74 : vector<8x128xi1>, vector<8x128xf32>
    %c16_i32_26 = arith.constant 16 : i32
    %88 = vector.broadcast %c16_i32_26 : i32 to vector<8x128xi32>
    %89 = arith.subi %75, %88 : vector<8x128xi32>
    %c63_i32_27 = arith.constant 63 : i32
    %90 = vector.broadcast %c63_i32_27 : i32 to vector<8x128xi32>
    %91 = arith.andi %89, %90 : vector<8x128xi32>
    %c32_i32_28 = arith.constant 32 : i32
    %92 = vector.broadcast %c32_i32_28 : i32 to vector<8x128xi32>
    %93 = arith.cmpi slt, %91, %92 : vector<8x128xi32>
    %cst_29 = arith.constant 0.000000e+00 : f32
    %94 = vector.broadcast %cst_29 : f32 to vector<8x128xf32>
    %95 = arith.select %93, %87, %94 : vector<8x128xi1>, vector<8x128xf32>
    %c16_i32_30 = arith.constant 16 : i32
    %96 = tpu.dynamic_rotate %95 by %c16_i32_30 dim 1 : vector<8x128xf32>, i32 -> vector<8x128xf32>
    %c112_i32_31 = arith.constant 112 : i32
    %97 = tpu.dynamic_rotate %95 by %c112_i32_31 dim 1 : vector<8x128xf32>, i32 -> vector<8x128xf32>
    %98 = arith.addf %96, %97 : vector<8x128xf32>
    %99 = arith.select %93, %98, %87 : vector<8x128xi1>, vector<8x128xf32>
    %c8_i32_32 = arith.constant 8 : i32
    %100 = vector.broadcast %c8_i32_32 : i32 to vector<8x128xi32>
    %101 = arith.subi %75, %100 : vector<8x128xi32>
    %c31_i32_33 = arith.constant 31 : i32
    %102 = vector.broadcast %c31_i32_33 : i32 to vector<8x128xi32>
    %103 = arith.andi %101, %102 : vector<8x128xi32>
    %c16_i32_34 = arith.constant 16 : i32
    %104 = vector.broadcast %c16_i32_34 : i32 to vector<8x128xi32>
    %105 = arith.cmpi slt, %103, %104 : vector<8x128xi32>
    %cst_35 = arith.constant 0.000000e+00 : f32
    %106 = vector.broadcast %cst_35 : f32 to vector<8x128xf32>
    %107 = arith.select %105, %99, %106 : vector<8x128xi1>, vector<8x128xf32>
    %c8_i32_36 = arith.constant 8 : i32
    %108 = tpu.dynamic_rotate %107 by %c8_i32_36 dim 1 : vector<8x128xf32>, i32 -> vector<8x128xf32>
    %c120_i32_37 = arith.constant 120 : i32
    %109 = tpu.dynamic_rotate %107 by %c120_i32_37 dim 1 : vector<8x128xf32>, i32 -> vector<8x128xf32>
    %110 = arith.addf %108, %109 : vector<8x128xf32>
    %111 = arith.select %105, %110, %99 : vector<8x128xi1>, vector<8x128xf32>
    %112 = tpu.concatenate %73, %111 in 1 : vector<8x128xf32>, vector<8x128xf32> -> vector<8x256xf32>
    %c0_38 = arith.constant 0 : index
    %c0_39 = arith.constant 0 : index
    %113 = vector.load %arg2[%c0_38, %c0_39] : memref<8x256xf32, #tpu.memory_space<vmem>>, vector<8x256xf32>
    tpu.vector_store %arg2[%c0_38, %c0_39], %112 {strides = array<i32>} : memref<8x256xf32, #tpu.memory_space<vmem>>, vector<8x256xf32>,
    return
  }
  func.func @transform_0(%arg0: i32) -> (i32, i32) {
    %c0_i32 = arith.constant 0 : i32
    %c0_i32_0 = arith.constant 0 : i32
    return %arg0, %c0_i32 : i32, i32
  }
  func.func @transform_1(%arg0: i32) -> (i32, i32) {
    %c0_i32 = arith.constant 0 : i32
    %c0_i32_0 = arith.constant 0 : i32
    return %arg0, %c0_i32 : i32, i32
  }
}

</mosaic_0001>

<bundles_post_ra>
// kernel: tpu_custom_call.1
= control target key start
LH: loop header
LB: loop body
LE: loop exit
PB: predicated region body
PF: predicated region fallthrough
CT: control target
= control target key end

     0   :  { %6 = vsyncpa [#allocation3], 0  ;;  %s516_s0 = inlined_call_operand.hbm [shape: f32[8,128], index: 0, kind: input, shape index: {}]   ;;  %s517_s1 = inlined_call_operand.hbm [shape: f32[8,256], index: 1, kind: output, shape index: {}]  }
   0x1   :  { %7 = vsyncpa [#allocation4], 0  ;;  %s402_s6 = smov [#allocation2]   ;;  %s354_s10 = scalar_lea.hbm %s516_s0, 128 }
   0x2   :  { %s14_s7 = sshll.u32 %s402_s6, 4  ;;  %p355_p0 = scmp.ne.s32.totalorder %s516_s0, %s354_s10  ;;  %s15_s7 = int_to_ptr.vmem [resolvable:$true] %s14_s7 }
   0x3   :  { %p358_p1 = scmp.lt.u32.totalorder %s354_s10, %s516_s0 }
   0x5   :  { %p360_p2 = pnand %p358_p1, %p355_p0 }
   0x7   :  { %363 = shalt.err (!%p360_p2)
}
   0x8   :  { %s364_s15 = scalar_lea.vmem %s15_s7, 128  ;;  %p369_p4 = scmp.lt.s32.totalorder %s15_s7, %s15_s7 }
   0x9   :  { %p365_p3 = scmp.ne.s32.totalorder %s15_s7, %s364_s15  ;;  %p370_p5 = scmp.lt.s32.totalorder %s364_s15, %s364_s15 }
   0xb   :  { %p371_p6 = por %p370_p5, %p369_p4 }
   0xd   :  { %p372_p7 = pnand %p371_p6, %p365_p3 }
   0xf   :  { %375 = shalt.err (!%p372_p7)
}
  0x10   :  { %17 = dma.hbm_to_vmem [thread:$0]  %s516_s0, 128, %s15_s7, [#allocation3]  }
  0x11   :  { %398 = dma.done.wait [#allocation3], 128  }
  0x12   :  { %399 = vsyncadd [#allocation3], 4294967168  ;;  %v22_v0 = vlaneseq  ;;  %v403_v6 = vmov 1.0   ;;  %v21_v11 = vld [vmem:[#allocation2] sm:$0xff]  ;;  %v404_v25 = vmov 683565275  }
  0x13   :  { %v405_v27 = vmov 2475754826   ;;  %v406_v29 = vmov 2131351028   ;;  %v407_v31 = vmov 2102212464  }
  0x14   :  { %v440_v1 = vand.u32 127, %v22_v0  ;;  %v408_v33 = vmov 920167782   ;;  %v409_v40 = vmov 1326507024   ;;  %s410_s0 = smov 64  }
  0x15   :  { %s411_s18 = smov 32   ;;  %s412_s19 = smov 96  }
  0x16   :  { %v24_v2 = vand.u32 7, %v440_v1  ;;  %s413_s20 = smov 112   ;;  %s414_s21 = smov 16  }
  0x17   :  { %s415_s22 = smov 120   ;;  %s416_s23 = smov 8  }
  0x18   :  { %v25_v3 = vand.u32 1, %v24_v2  ;;  %v28_v4 = vand.u32 2, %v24_v2  ;;  %v32_v5 = vand.u32 4, %v24_v2  ;;  %s417_s24 = smov [#allocation5]  }
  0x19   :  { %s310_s25 = sshll.u32 %s417_s24, 4  ;;  %s311_s25 = int_to_ptr.vmem [resolvable:$true] %s310_s25 }
  0x1a   :  { %vm26_vm0 = vcmp.ne.s32.totalorder %v25_v3, 0  ;;  %vm29_vm1 = vcmp.ne.s32.totalorder %v28_v4, 0  ;;  %vm33_vm2 = vcmp.ne.s32.totalorder %v32_v5, 0  ;;  %s376_s26 = scalar_lea.vmem %s311_s25, 256  ;;  %p381_p9 = scmp.lt.s32.totalorder %s311_s25, %s311_s25 }
  0x1b   :  { %v27_v7 = vsel %vm26_vm0, 2.0, %v403_v6  ;;  %v30_v8 = vsel %vm29_vm1, 4.0, %v403_v6  ;;  %v34_v9 = vsel %vm33_vm2, 16.0, %v403_v6  ;;  %p377_p8 = scmp.ne.s32.totalorder %s311_s25, %s376_s26  ;;  %p382_p10 = scmp.lt.s32.totalorder %s376_s26, %s376_s26 }
  0x1c   :  { %v31_v10 = vmul.f32 %v30_v8, %v27_v7 }
  0x1d   :  { %p383_p11 = por %p382_p10, %p381_p9 }
  0x1e   :  { %v35_v12 = vmul.f32 %v34_v9, %v31_v10 }
  0x1f   :  { %p384_p12 = pnand %p383_p11, %p377_p8 }
  0x20   :  { %v443_v13 = vmul.f32 %v35_v12, %v21_v11 }
  0x22   :  { %v40_v14 = vand.u32 2139095040, %v443_v13  ;;  %v37_v16 = vand.u32 2147483647, %v443_v13  ;;  %vm39_vm10 = vcmp.lt.s32.totalorder %v443_v13, 0  ;;  %vm129_vm2 = vweird.f32 %v443_v13 }
  0x24   :  { %v41_v15 = vshrl.u32 %v40_v14, 23  ;;  %v44_v19 = vand.u32 8388607, %v37_v16  ;;  %vm38_vm11 = vcmp.le.f32.partialorder %v37_v16, 0.7853982 }
  0x26   :  { %v319_v17 = vadd.s32 4294967169, %v41_v15  ;;  %v45_v22 = vor.u32 8388608, %v44_v19 }
  0x28   :  { %v47_v18 = vadd.s32 1, %v319_v17  ;;  %v85_v42 = vshll.u32 %v45_v22, 8 }
  0x2a   :  { %vm48_vm3 = vcmp.gt.s32.totalorder %v47_v18, 0 }
  0x2b   :  { %v49_v20 = vsel %vm48_vm3, %v47_v18, 0  ;;  %vm244_vm3 = vcmp.lt.s32.totalorder %v440_v1, 64 }
  0x2c   :  { %v51_v21 = vand.u32 31, %v49_v20  ;;  %v50_v23 = vshrl.u32 %v49_v20, 5 }
  0x2e   :  { %v52_v24 = vsub.s32 32, %v51_v21  ;;  %v54_v26 = vshll.u32 %v404_v25, %v51_v21  ;;  %v57_v28 = vshll.u32 %v405_v27, %v51_v21  ;;  %v60_v30 = vshll.u32 %v406_v29, %v51_v21 }
  0x2f   :  { %v63_v32 = vshll.u32 %v407_v31, %v51_v21  ;;  %v66_v34 = vshll.u32 %v408_v33, %v51_v21  ;;  %vm69_vm4 = vcmp.lt.s32.totalorder %v50_v23, 1  ;;  %vm72_vm5 = vcmp.lt.s32.totalorder %v50_v23, 4 }
  0x30   :  { %v53_v35 = vshrl.u32 %v404_v25, %v52_v24  ;;  %v55_v36 = vshrl.u32 %v405_v27, %v52_v24  ;;  %v58_v37 = vshrl.u32 %v406_v29, %v52_v24  ;;  %v61_v38 = vshrl.u32 %v407_v31, %v52_v24 }
  0x31   :  { %v64_v39 = vshrl.u32 %v408_v33, %v52_v24  ;;  %v67_v41 = vshrl.u32 %v409_v40, %v52_v24  ;;  %vm70_vm6 = vcmp.lt.s32.totalorder %v50_v23, 2  ;;  %vm71_vm7 = vcmp.lt.s32.totalorder %v50_v23, 3 }
  0x32   :  { %v56_v43 = vor.u32 %v55_v36, %v54_v26  ;;  %v59_v44 = vor.u32 %v58_v37, %v57_v28  ;;  %v62_v45 = vor.u32 %v61_v38, %v60_v30 }
  0x33   :  { %v65_v46 = vor.u32 %v64_v39, %v63_v32  ;;  %v68_v47 = vor.u32 %v67_v41, %v66_v34 }
  0x34   :  { %v73_v48 = vsel %vm69_vm4, %v53_v35, %v56_v43  ;;  %v74_v49 = vsel %vm72_vm5, %v62_v45, 2102212464  ;;  %v77_v50 = vsel %vm69_vm4, %v56_v43, %v59_v44  ;;  %v81_v51 = vsel %vm69_vm4, %v59_v44, %v62_v45 }
  0x35   :  { %v75_v52 = vsel %vm71_vm7, %v59_v44, %v74_v49  ;;  %v78_v53 = vsel %vm72_vm5, %v65_v46, 920167782  ;;  %v82_v54 = vsel %vm72_vm5, %v68_v47, 1326507024 }
  0x36   :  { %v79_v55 = vsel %vm71_vm7, %v62_v45, %v78_v53  ;;  %v83_v56 = vsel %vm71_vm7, %v65_v46, %v82_v54  ;;  %v76_v57 = vsel %vm70_vm6, %v73_v48, %v75_v52  ;;  %v327_v48 = vadd.s32 4294967264, %v440_v1 }
  0x37   :  { %v80_v58 = vsel %vm70_vm6, %v77_v50, %v79_v55  ;;  %v84_v59 = vsel %vm70_vm6, %v81_v51, %v83_v56  ;;  %v92_v0 = vmul.u32 %v85_v42, %v76_v57  ;;  %v328_v56 = vadd.s32 4294967280, %v440_v1 }
  0x38   :  { %v449_v60 = vmul.u32.u64.low %v85_v42, %v84_v59  ;;  %v450_v61 = vmul.u32.u64.high %v85_v42, %v84_v59, %v449_v60  ;;  %v452_v62 = vmul.u32.u64.low %v85_v42, %v80_v58  ;;  %v453_v63 = vmul.u32.u64.high %v85_v42, %v80_v58, %v452_v62 }
  0x39   :  { %v251_v49 = vand.u32 127, %v327_v48  ;;  %v261_v58 = vand.u32 63, %v328_v56 }
  0x3a   :  { %vm94_vm8 = vc.u32 %v450_v61, %v452_v62  ;;  %v95_v2 = vadd.s32 1, %v453_v63  ;;  %v93_v14 = vadd.s32 %v452_v62, %v450_v61 }
  0x3b   :  { %vm466_vm4 = vcmp.lt.s32.totalorder %v251_v49, 64  ;;  %vm475_vm5 = vcmp.lt.s32.totalorder %v261_v58, 32 }
  0x3c   :  { %v96_v3 = vsel %vm94_vm8, %v95_v2, %v453_v63 }
  0x3d   :  { %v97_v4 = vadd.s32 %v96_v3, %v92_v0 }
  0x3f   :  { %v98_v5 = vadd.s32 536870912, %v97_v4 }
  0x41   :  { %v99_v6 = vshrl.u32 %v98_v5, 30 }
  0x43   :  { %v100_v7 = vshll.u32 %v99_v6, 30  ;;  %v123_v28 = vsub.s32 4, %v99_v6 }
  0x45   :  { %v101_v8 = vsub.s32 %v97_v4, %v100_v7  ;;  %v124_v31 = vsel %vm39_vm10, %v123_v28, %v99_v6  ;;  %v329_v6 = vadd.s32 4294967288, %v440_v1 }
  0x46   :  { %v126_v33 = vsel %vm38_vm11, 0, %v124_v31 }
  0x47   :  { %v103_v9 = vsub.s32 0, %v101_v8  ;;  %v130_v34 = vadd.s32 3, %v126_v33  ;;  %v234_v35 = vand.u32 3, %v126_v33  ;;  %v271_v7 = vand.u32 31, %v329_v6 }
  0x49   :  { %v320_v10 = vmin.u32 %v103_v9, %v101_v8  ;;  %v131_v36 = vand.u32 3, %v130_v34  ;;  %vm239_vm12 = vcmp.eq.s32.totalorder %v234_v35, 2  ;;  %vm236_vm14 = vcmp.eq.s32.totalorder %v234_v35, 0 }
  0x4a   :  { %vm235_vm0 = vcmp.lt.s32.totalorder %v234_v35, 2  ;;  %vm488_vm6 = vcmp.lt.s32.totalorder %v271_v7, 16 }
  0x4b   :  { %v105_v11 = vclz %v320_v10  ;;  %vm136_vm13 = vcmp.eq.s32.totalorder %v131_v36, 2  ;;  %vm133_vm15 = vcmp.eq.s32.totalorder %v131_v36, 0  ;;  %vm132_vm1 = vcmp.lt.s32.totalorder %v131_v36, 2 }
  0x4d   :  { %v321_v12 = vadd.s32 4294967294, %v105_v11 }
  0x4f   :  { %vm322_vm9 = vcmp.lt.s32.totalorder %v321_v12, 0 }
  0x50   :  { %v108_v15 = vsel %vm322_vm9, 0, %v321_v12 }
  0x51   :  { %v109_v17 = vsub.s32 32, %v108_v15  ;;  %v110_v18 = vshll.u32 %v101_v8, %v108_v15  ;;  %v113_v19 = vsub.s32 4294967266, %v108_v15 }
  0x53   :  { %v111_v20 = vshrl.u32 %v93_v14, %v109_v17  ;;  %v114_v21 = vadd.s32 127, %v113_v19 }
  0x55   :  { %v112_v22 = vor.u32 %v111_v20, %v110_v18  ;;  %v115_v23 = vshll.u32 %v114_v21, 23 }
  0x57   :  { %v116_v24 = vor.u32 4788187, %v115_v23  ;;  %v119_v25 = vcvt.s32.f32 %v112_v22 }
  0x59   :  { %v117_v26 = vand.u32 2147483647, %v116_v24 }
  0x5b   :  { %v120_v27 = vmul.f32 %v119_v25, %v117_v26 }
  0x5d   :  { %v121_v29 = vxor.u32 2147483648, %v120_v27 }
  0x5f   :  { %v122_v30 = vsel %vm39_vm10, %v121_v29, %v120_v27 }
  0x60   :  { %v125_v32 = vsel %vm38_vm11, %v443_v13, %v122_v30 }
  0x61   :  { %350 = vcosq.f32 %v125_v32 }
  0x62   :  { %352 = vsinq.f32 %v125_v32 }
  0x6b   :  { %v351_v37 = vpop.eup %350 }
  0x6c   :  { %v353_v38 = vpop.eup %352  ;;  %v137_v39 = vxor.u32 2147483648, %v351_v37 }
  0x6d   :  { %v134_v40 = vxor.u32 2147483648, %v353_v38 }
  0x6e   :  { %v241_v16 = vsel %vm239_vm12, %v137_v39, %v353_v38  ;;  %v138_v41 = vsel %vm136_vm13, %v137_v39, %v353_v38 }
  0x6f   :  { %v238_v42 = vsel %vm236_vm14, %v351_v37, %v134_v40  ;;  %v135_v43 = vsel %vm133_vm15, %v351_v37, %v134_v40 }
  0x70   :  { %v242_v44 = vsel %vm235_vm0, %v238_v42, %v241_v16  ;;  %v139_v45 = vsel %vm132_vm1, %v135_v43, %v138_v41 }
  0x71   :  { %v243_v46 = vsel %vm129_vm2, nan, %v242_v44  ;;  %v140_v47 = vsel %vm129_vm2, nan, %v139_v45 }
  0x72   :  { %245 = vrot.lane.b32.xlu0 %v243_v46, %s410_s0 }
  0x76   :  { %247 = vrot.lane.b32.xlu0 %v140_v47, %s410_s0 }
  0xe4   :  { %v246_v13 = vpop.permute.xlu0 %245 }
  0xe5   :  { %v249_v51 = vsel %vm244_vm3, %v140_v47, %v246_v13 }
  0xe6   :  { %v253_v52 = vsel %vm466_vm4, %v249_v51, 0.0 }
  0xe7   :  { %254 = vrot.lane.b32.xlu1 %v253_v52, %s411_s18 }
  0xe8   :  { %v248_v53 = vpop.permute.xlu0 %247 }
  0xe9   :  { %v280_v54 = vsel %vm244_vm3, %v248_v53, %v243_v46 }
  0xea   :  { %v281_v55 = vsel %vm466_vm4, %v280_v54, 0.0 }
  0xeb   :  { %256 = vrot.lane.b32.xlu1 %v253_v52, %s412_s19  ;;  %282 = vrot.lane.b32.xlu0 %v281_v55, %s411_s18 }
  0xef   :  { %284 = vrot.lane.b32.xlu1 %v281_v55, %s412_s19 }
 0x159   :  { %v255_v57 = vpop.permute.xlu1 %254 }
 0x15d   :  { %v257_v59 = vpop.permute.xlu1 %256  ;;  %v283_v62 = vpop.permute.xlu0 %282 }
 0x15e   :  { %v258_v60 = vadd.f32 %v257_v59, %v255_v57 }
 0x160   :  { %v259_v63 = vsel %vm466_vm4, %v258_v60, %v249_v51 }
 0x161   :  { %v285_v0 = vpop.permute.xlu1 %284  ;;  %v263_v2 = vsel %vm475_vm5, %v259_v63, 0.0 }
 0x162   :  { %v286_v3 = vadd.f32 %v285_v0, %v283_v62  ;;  %266 = vrot.lane.b32.xlu1 %v263_v2, %s413_s20  ;;  %264 = vrot.lane.b32.xlu0 %v263_v2, %s414_s21 }
 0x164   :  { %v287_v4 = vsel %vm466_vm4, %v286_v3, %v280_v54 }
 0x165   :  { %v288_v5 = vsel %vm475_vm5, %v287_v4, 0.0 }
 0x166   :  { %291 = vrot.lane.b32.xlu1 %v288_v5, %s413_s20  ;;  %289 = vrot.lane.b32.xlu0 %v288_v5, %s414_s21 }
 0x1d4   :  { %v265_v8 = vpop.permute.xlu0 %264  ;;  %v267_v9 = vpop.permute.xlu1 %266 }
 0x1d5   :  { %v268_v10 = vadd.f32 %v267_v9, %v265_v8 }
 0x1d7   :  { %v269_v12 = vsel %vm475_vm5, %v268_v10, %v259_v63 }
 0x1d8   :  { %v290_v14 = vpop.permute.xlu0 %289  ;;  %v292_v15 = vpop.permute.xlu1 %291  ;;  %v273_v17 = vsel %vm488_vm6, %v269_v12, 0.0 }
 0x1d9   :  { %v293_v18 = vadd.f32 %v292_v15, %v290_v14  ;;  %276 = vrot.lane.b32.xlu1 %v273_v17, %s415_s22  ;;  %274 = vrot.lane.b32.xlu0 %v273_v17, %s416_s23 }
 0x1db   :  { %v294_v1 = vsel %vm475_vm5, %v293_v18, %v287_v4 }
 0x1dc   :  { %v295_v19 = vsel %vm488_vm6, %v294_v1, 0.0 }
 0x1dd   :  { %298 = vrot.lane.b32.xlu1 %v295_v19, %s415_s22  ;;  %296 = vrot.lane.b32.xlu0 %v295_v19, %s416_s23 }
 0x24b   :  { %v275_v20 = vpop.permute.xlu0 %274  ;;  %v277_v21 = vpop.permute.xlu1 %276 }
 0x24c   :  { %v278_v22 = vadd.f32 %v277_v21, %v275_v20 }
 0x24e   :  { %v279_v23 = vsel %vm488_vm6, %v278_v22, %v269_v12 }
 0x24f   :  { %v297_v24 = vpop.permute.xlu0 %296  ;;  %v299_v25 = vpop.permute.xlu1 %298  ;;  %302 = vst [vmem:[#allocation5] sm:$0xff] %v279_v23 }
 0x250   :  { %v300_v26 = vadd.f32 %v299_v25, %v297_v24 }
 0x252   :  { %v301_v27 = vsel %vm488_vm6, %v300_v26, %v294_v1 }
 0x253   :  { %303 = vst [vmem:[#allocation5 + $0x8] sm:$0xff] %v301_v27 }
 0x254   :  { %387 = shalt.err (!%p384_p12)
}
 0x255   :  { %s388_s29 = scalar_lea.hbm %s517_s1, 256 }
 0x256   :  { %p389_p13 = scmp.ne.s32.totalorder %s517_s1, %s388_s29  ;;  %p392_p0 = scmp.lt.u32.totalorder %s388_s29, %s517_s1 }
 0x258   :  { %p394_p1 = pnand %p392_p0, %p389_p13 }
 0x25a   :  { %397 = shalt.err (!%p394_p1)
}
 0x25b   :  { %313 = dma.vmem_to_hbm [thread:$0]  %s311_s25, 256, %s517_s1, [#allocation4]  }
 0x25c   :  { %400 = dma.done.wait [#allocation4], 256  }
 0x25d   :  { %401 = vsyncadd [#allocation4], 4294967040 }
 0x25e   :  { %317 = vsyncpa [#allocation3], 1 }
 0x25f   :  { %318 = vsyncpa [#allocation4], 1 }

</bundles_post_ra>
